<compile_context>
chip_gen: v6e
topology: v6e:2x2x1
jax: 0.10.0
libtpu: 0.0.40
codegen_flags: <defaults>
</compile_context>

<pallas_src>
import functools

import jax
import jax.numpy as jnp
from jax import lax
from jax.experimental import pallas as pl
from jax.experimental.pallas import tpu as pltpu

LANES = 128
SUBLANES = 8
MAX_BLOCK_ROWS = 2048  # 2048 * 128 * 4 B = 1 MiB per f32 input tile


def _pixel_loss_kernel(gen_ref, org_ref, out_ref, *, block_rows, rows_valid,
                       mask_needed):
    """One grid step: partial sum of squared diffs for a (block_rows, 128) tile.

    gen_ref/org_ref: (block_rows, 128) VMEM tiles (any float dtype).
    out_ref:         (1, 1, 128) VMEM tile of per-lane partial sums (f32).
    """
    g = gen_ref[...].astype(jnp.float32)
    o = org_ref[...].astype(jnp.float32)
    d = o - g
    dd = d * d

    if mask_needed:
        # The last grid block may read past the end of the (rows, 128) slab;
        # zero out the invalid rows (selected via where, so OOB garbage —
        # even NaN/Inf — never reaches the sum).
        i = pl.program_id(0)
        valid_rows = rows_valid - i * block_rows
        row_ids = lax.broadcasted_iota(jnp.int32, dd.shape, 0)
        dd = jnp.where(row_ids < valid_rows, dd, 0.0)

    # Sublane-only reduction (cheap, hides under the DMA stream); the cross-lane
    # reduction happens once, in the wrapper.
    out_ref[0] = jnp.sum(dd, axis=0, keepdims=True)


def _pixel_loss_partials(g2d, o2d, rows, block_rows):
    grid_size = pl.cdiv(rows, block_rows)
    mask_needed = (rows % block_rows) != 0
    kernel = functools.partial(
        _pixel_loss_kernel,
        block_rows=block_rows,
        rows_valid=rows,
        mask_needed=mask_needed,
    )
    return pl.pallas_call(
        kernel,
        out_shape=jax.ShapeDtypeStruct((grid_size, 1, LANES), jnp.float32),
        grid_spec=pltpu.PrefetchScalarGridSpec(
            num_scalar_prefetch=0,
            grid=(grid_size,),
            in_specs=[
                pl.BlockSpec((block_rows, LANES), lambda i: (i, 0)),
                pl.BlockSpec((block_rows, LANES), lambda i: (i, 0)),
            ],
            out_specs=pl.BlockSpec((1, 1, LANES), lambda i: (i, 0, 0)),
        ),
        compiler_params=pltpu.CompilerParams(
            # Each step writes its own output block -> fully parallel grid
            # (lets v7x split the stream across its two TensorCores).
            dimension_semantics=("parallel",),
        ),
    )(g2d, o2d)


def pixel_loss(gen_img, origin_img):
    """Computes mean((origin_img - gen_img)**2) with a Pallas TPU kernel."""
    assert gen_img.shape == origin_img.shape
    n_elems = gen_img.size

    flat_g = gen_img.reshape(-1)
    flat_o = origin_img.reshape(-1)

    rows = n_elems // LANES
    n_main = rows * LANES
    if rows < SUBLANES:
        # Tiny input: not worth a kernel launch; the whole thing goes through
        # the scalar epilogue below.
        rows = 0
        n_main = 0

    total = jnp.float32(0.0)

    if rows > 0:
        # Largest sublane-aligned tile that (a) fits the slab and (b) stays at
        # ~1 MiB per f32 input (4 MiB VMEM with 2 inputs x double buffering).
        block_rows = min(MAX_BLOCK_ROWS, (rows // SUBLANES) * SUBLANES)
        g2d = flat_g[:n_main].reshape(rows, LANES)
        o2d = flat_o[:n_main].reshape(rows, LANES)
        partials = _pixel_loss_partials(g2d, o2d, rows, block_rows)
        total = total + jnp.sum(partials)

    if n_main < n_elems:
        # Sub-128-element remainder: trivially cheap, avoids any full-tensor pad.
        gt = flat_g[n_main:].astype(jnp.float32)
        ot = flat_o[n_main:].astype(jnp.float32)
        dt = ot - gt
        total = total + jnp.sum(dt * dt)

    return total / jnp.float32(n_elems)


if __name__ == "__main__":
    key = jax.random.PRNGKey(0)
    k1, k2 = jax.random.split(key)

    # Small NCHW shapes consistent with the module's image-loss use case.
    gen_img = jax.random.normal(k1, (2, 4, 16, 16), dtype=jnp.float32)
    origin_img = jax.random.normal(k2, (2, 4, 16, 16), dtype=jnp.float32)

    loss = jax.block_until_ready(pixel_loss(gen_img, origin_img))
    ref = jnp.mean((origin_img - gen_img) ** 2)
    assert jnp.allclose(loss, ref, rtol=1e-5, atol=1e-6), (loss, ref)

    # Exercise the in-kernel mask (rows not a multiple of the block) and the
    # wrapper tail path (element count not a multiple of 128).
    k3, k4 = jax.random.split(k1)
    g_odd = jax.random.normal(k3, (1, 3, 21, 23), dtype=jnp.float32)
    o_odd = jax.random.normal(k4, (1, 3, 21, 23), dtype=jnp.float32)
    loss_odd = jax.block_until_ready(pixel_loss(g_odd, o_odd))
    ref_odd = jnp.mean((o_odd - g_odd) ** 2)
    assert jnp.allclose(loss_odd, ref_odd, rtol=1e-5, atol=1e-6), (loss_odd, ref_odd)

    # TODO(synk): pixel_loss.requires_grad_(True) is a PyTorch autograd flag
    # with no Pallas/JAX forward-pass equivalent (grads come from jax.grad).
    print("KERNEL_OK")
</pallas_src>

<mosaic_0001>
module attributes {stable_mosaic.version = 11 : i64} {
  func.func @_pixel_loss_kernel(%arg0: i32, %arg1: memref<16x128xf32, #tpu.memory_space<vmem>>, %arg2: memref<16x128xf32, #tpu.memory_space<vmem>>, %arg3: memref<1x1x128xf32, #tpu.memory_space<vmem>>) attributes {dimension_semantics = [#tpu.dimension_semantics<parallel>], iteration_bounds = array<i64: 1>, scalar_prefetch = 0 : i64, scratch_operands = 0 : i64, tpu.core_type = #tpu.core_type<tc>, window_params = [{transform_indices = @transform_0, window_bounds = array<i64: 16, 128>}, {transform_indices = @transform_1, window_bounds = array<i64: 16, 128>}, {transform_indices = @transform_2, window_bounds = array<i64: 1, 1, 128>}]} {
    %c0 = arith.constant 0 : index
    %c0_0 = arith.constant 0 : index
    %0 = vector.load %arg1[%c0, %c0_0] : memref<16x128xf32, #tpu.memory_space<vmem>>, vector<16x128xf32>
    %c0_1 = arith.constant 0 : index
    %c0_2 = arith.constant 0 : index
    %1 = vector.load %arg2[%c0_1, %c0_2] : memref<16x128xf32, #tpu.memory_space<vmem>>, vector<16x128xf32>
    %2 = arith.subf %1, %0 : vector<16x128xf32>
    %3 = arith.mulf %2, %2 : vector<16x128xf32>
    %cst = arith.constant dense<0.000000e+00> : vector<128xf32>
    %4 = vector.multi_reduction <add>, %3, %cst [0] : vector<16x128xf32> to vector<128xf32>
    %5 = vector.shape_cast %4 : vector<128xf32> to vector<1x128xf32>
    %c0_3 = arith.constant 0 : index
    %c0_4 = arith.constant 0 : index
    %c0_5 = arith.constant 0 : index
    %6 = vector.load %arg3[%c0_3, %c0_4, %c0_5] : memref<1x1x128xf32, #tpu.memory_space<vmem>>, vector<1x1x128xf32>
    %7 = vector.shape_cast %6 : vector<1x1x128xf32> to vector<1x128xf32>
    %8 = vector.shape_cast %5 : vector<1x128xf32> to vector<1x1x128xf32>
    tpu.vector_store %arg3[%c0_3, %c0_4, %c0_5], %8 {strides = array<i32>} : memref<1x1x128xf32, #tpu.memory_space<vmem>>, vector<1x1x128xf32>,
    return
  }
  func.func @transform_0(%arg0: i32) -> (i32, i32) {
    %c0_i32 = arith.constant 0 : i32
    %c0_i32_0 = arith.constant 0 : i32
    return %arg0, %c0_i32 : i32, i32
  }
  func.func @transform_1(%arg0: i32) -> (i32, i32) {
    %c0_i32 = arith.constant 0 : i32
    %c0_i32_0 = arith.constant 0 : i32
    return %arg0, %c0_i32 : i32, i32
  }
  func.func @transform_2(%arg0: i32) -> (i32, i32, i32) {
    %c0_i32 = arith.constant 0 : i32
    %c0_i32_0 = arith.constant 0 : i32
    %c0_i32_1 = arith.constant 0 : i32
    return %arg0, %c0_i32, %c0_i32_0 : i32, i32, i32
  }
}

</mosaic_0001>

<bundles_post_ra>
// kernel: tpu_custom_call.1
= control target key start
LH: loop header
LB: loop body
LE: loop exit
PB: predicated region body
PF: predicated region fallthrough
CT: control target
= control target key end

     0   :  { %7 = vsyncpa [#allocation3], 0  ;;  %s172_s0 = inlined_call_operand.hbm [shape: f32[16,128], index: 0, kind: input, shape index: {}]   ;;  %s173_s1 = inlined_call_operand.hbm [shape: f32[16,128], index: 1, kind: input, shape index: {}]   ;;  %s174_s2 = inlined_call_operand.hbm [shape: f32[1,1,128], index: 2, kind: output, shape index: {}]  }
   0x1   :  { %8 = vsyncpa [#allocation6], 0 }
   0x2   :  { %9 = vsyncpa [#allocation4], 0  ;;  %s143_s9 = smov [#allocation2]  }
   0x3   :  { %s15_s10 = sshll.u32 %s143_s9, 4  ;;  %s16_s10 = int_to_ptr.vmem [resolvable:$true] %s15_s10 }
   0x4   :  { %s85_s11 = scalar_lea.vmem %s16_s10, 256  ;;  %p90_p1 = scmp.lt.s32.totalorder %s16_s10, %s16_s10 }
   0x5   :  { %p86_p0 = scmp.ne.s32.totalorder %s16_s10, %s85_s11  ;;  %p91_p2 = scmp.lt.s32.totalorder %s85_s11, %s85_s11 }
   0x7   :  { %p92_p3 = por %p91_p2, %p90_p1 }
   0x9   :  { %p93_p4 = pnand %p92_p3, %p86_p0 }
   0xb   :  { %96 = shalt.err (!%p93_p4)
}
   0xc   :  { %s144_s12 = smov 128   ;;  %s145_s13 = smov 8  }
   0xd   :  { %21 = dma.hbm_to_vmem [thread:$0]  %s172_s0, 256, %s16_s10, [#allocation3], %s144_s12, %s144_s12, %s145_s13  }
   0xe   :  { %s146_s16 = smov [#allocation5]  }
   0xf   :  { %s27_s17 = sshll.u32 %s146_s16, 4  ;;  %s28_s17 = int_to_ptr.vmem [resolvable:$true] %s27_s17 }
  0x10   :  { %s105_s18 = scalar_lea.vmem %s28_s17, 256  ;;  %p110_p6 = scmp.lt.s32.totalorder %s28_s17, %s28_s17 }
  0x11   :  { %p106_p5 = scmp.ne.s32.totalorder %s28_s17, %s105_s18  ;;  %p111_p7 = scmp.lt.s32.totalorder %s105_s18, %s105_s18 }
  0x13   :  { %p112_p8 = por %p111_p7, %p110_p6 }
  0x15   :  { %p113_p9 = pnand %p112_p8, %p106_p5 }
  0x17   :  { %116 = shalt.err (!%p113_p9)
}
  0x18   :  { %33 = dma.hbm_to_vmem [thread:$0]  %s173_s1, 256, %s28_s17, [#allocation6], %s144_s12, %s144_s12, %s145_s13  }
  0x19   :  { %137 = dma.done.wait [#allocation3], 256  }
  0x1a   :  { %138 = vsyncadd [#allocation3], 4294967040 }
  0x1b   :  { %139 = dma.done.wait [#allocation6], 256  }
  0x1c   :  { %140 = vsyncadd [#allocation6], 4294967040  ;;  %v40_v0 = vld [vmem:[#allocation2] sm:$0xff]  ;;  %v41_v1 = vld [vmem:[#allocation2 + $0x8] sm:$0xff]  ;;  %s147_s0 = smov [#allocation7]  }
  0x1d   :  { %v42_v2 = vld [vmem:[#allocation5] sm:$0xff]  ;;  %v43_v3 = vld [vmem:[#allocation5 + $0x8] sm:$0xff]  ;;  %s62_s21 = sshll.u32 %s147_s0, 4  ;;  %s63_s21 = int_to_ptr.vmem [resolvable:$true] %s62_s21 }
  0x1e   :  { %v44_v4 = vsub.f32 %v42_v2, %v40_v0  ;;  %v45_v5 = vsub.f32 %v43_v3, %v41_v1  ;;  %s117_s1 = scalar_lea.vmem %s63_s21, 16  ;;  %s121_s22 = scalar_lea.vmem %s63_s21, 32 }
  0x1f   :  { %p118_p10 = scmp.ne.s32.totalorder %s63_s21, %s117_s1  ;;  %p122_p11 = scmp.lt.s32.totalorder %s63_s21, %s63_s21 }
  0x20   :  { %v46_v6 = vmul.f32 %v44_v4, %v44_v4  ;;  %v47_v7 = vmul.f32 %v45_v5, %v45_v5  ;;  %p123_p12 = scmp.lt.s32.totalorder %s121_s22, %s117_s1 }
  0x22   :  { %v48_v8 = vadd.f32 %v47_v7, %v46_v6  ;;  %p124_p13 = por %p123_p12, %p122_p11 }
  0x24   :  { %v49_v9 = vrot.slane %v48_v8, 4  ;;  %p125_p0 = pnand %p124_p13, %p118_p10 }
  0x26   :  { %v50_v10 = vadd.f32 %v49_v9, %v48_v8 }
  0x28   :  { %v51_v11 = vrot.slane %v50_v10, 2 }
  0x2a   :  { %v52_v12 = vadd.f32 %v51_v11, %v50_v10 }
  0x2c   :  { %v53_v13 = vrot.slane %v52_v12, 1 }
  0x2e   :  { %v54_v14 = vadd.f32 %v53_v13, %v52_v12 }
  0x30   :  { %55 = vst [vmem:[#allocation7] sm:$0x1] %v54_v14 }
  0x31   :  { %128 = shalt.err (!%p125_p0)
}
  0x32   :  { %65 = dma.vmem_to_hbm [thread:$0]  %s63_s21, 16, %s174_s2, [#allocation4]  }
  0x33   :  { %141 = dma.done.wait [#allocation4], 16  }
  0x34   :  { %142 = vsyncadd [#allocation4], 4294967280 }
  0x35   :  { %69 = vsyncpa [#allocation3], 1 }
  0x36   :  { %70 = vsyncpa [#allocation6], 1 }
  0x37   :  { %71 = vsyncpa [#allocation4], 1 }

</bundles_post_ra>
